<compile_context>
chip_gen: v7x
topology: tpu7x:2x2x1
jax: 0.10.0
libtpu: 0.0.40
codegen_flags: <defaults>
</compile_context>

<pallas_src>
import functools

import jax
import jax.numpy as jnp
from jax.experimental import pallas as pl
from jax.experimental.pallas import tpu as pltpu

H1, H2 = 256, 128
NEG_SLOPE = 0.2


def _leaky_relu(h):
    return jnp.where(h > 0, h, NEG_SLOPE * h)


def _disc_kernel(x_ref, c_ref, w1_ref, b1_ref, w2_ref, b2_ref, w3_ref, b3_ref,
                 out_ref, *, act_dtype):
    # Fused concat: build the (tb, dx+dc) LHS inside one lane tile and run
    # layer 1 as a single MXU dot (instead of two dots + f32 add).
    lhs = jnp.concatenate([x_ref[...], c_ref[...]], axis=-1).astype(jnp.bfloat16)
    h1 = jnp.dot(lhs, w1_ref[...], preferred_element_type=jnp.float32)
    # Bias + LeakyReLU in act_dtype (bf16 on v6e/v7x, f32 on v5e).
    h1 = _leaky_relu(h1.astype(act_dtype) + b1_ref[...].astype(act_dtype))   # (tb, 256)

    h2 = jnp.dot(h1.astype(jnp.bfloat16), w2_ref[...],
                 preferred_element_type=jnp.float32)
    h2 = _leaky_relu(h2.astype(act_dtype) + b2_ref[...].astype(act_dtype))   # (tb, 128)

    # Final 128 -> 1 layer on the MXU (w3 is a (H2, 1) bf16 column); the
    # (tb, 1) store is a cheap masked vst.  b3 is a scalar living in SMEM.
    y = jnp.dot(h2.astype(jnp.bfloat16), w3_ref[...],
                preferred_element_type=jnp.float32)                          # (tb, 1)
    out_ref[...] = (y + b3_ref[0]).astype(out_ref.dtype)


def _round_up(v, m):
    return (v + m - 1) // m * m


def _tpu_defaults():
    """Best-effort per-generation defaults: (act_dtype, tile_b, want_two_tiles)."""
    kind = ""
    try:
        kind = jax.devices()[0].device_kind.lower()
    except Exception:
        pass
    if "v5 lite" in kind or "v5e" in kind or "v5litepod" in kind:
        # v5e: no bf16 VPU -> keep f32 activations; 1 vst slot -> smaller tiles.
        return jnp.float32, 256, False
    if "v7" in kind:
        # v7x: 2 TensorCores per chip -> prefer >= 2 grid tiles for large B.
        return jnp.bfloat16, 1024, True
    # v6e / unknown.
    return jnp.bfloat16, 1024, False


def conditional_discriminator(x, conditions, kparams, *, tile_b=None, act_dtype=None):
    """Forward pass. x: (B, input_dim) f32, conditions: (B, binary_dim) f32.
    kparams: output of prepare_kernel_params(). Returns (B, 1) f32."""
    B, dx = x.shape
    _, dc = conditions.shape

    auto_act, auto_tb, want_two_tiles = _tpu_defaults()
    if act_dtype is None:
        act_dtype = auto_act
    if tile_b is None:
        tile_b = auto_tb

    # Batch tiling: multiple-of-8 sublane tiles, no host-side padding.  When
    # tb does not divide B, Pallas pads the last block: garbage rows are
    # row-independent and their stores are dropped.
    tb = max(8, min(_round_up(tile_b, 8), _round_up(B, 8)))
    n_tiles = pl.cdiv(B, tb)
    if want_two_tiles and n_tiles < 2 and B >= 1024:
        tb = _round_up(pl.cdiv(B, 2), 8)
        n_tiles = pl.cdiv(B, tb)

    w1, b1 = kparams["w1"], kparams["b1"]
    w2, b2 = kparams["w2"], kparams["b2"]
    w3, b3 = kparams["w3"], kparams["b3"]

    const = lambda shape: pl.BlockSpec(shape, lambda i: (0, 0))

    flops = 2 * B * ((dx + dc) * H1 + H1 * H2 + H2)
    bytes_accessed = (
        x.size * x.dtype.itemsize
        + conditions.size * conditions.dtype.itemsize
        + sum(int(p.size) * p.dtype.itemsize for p in (w1, b1, w2, b2, w3, b3))
        + B * 1 * 4)

    kernel = functools.partial(_disc_kernel, act_dtype=act_dtype)

    out = pl.pallas_call(
        kernel,
        out_shape=jax.ShapeDtypeStruct((B, 1), jnp.float32),
        grid=(n_tiles,),
        in_specs=[
            pl.BlockSpec((tb, dx), lambda i: (i, 0)),      # x tile
            pl.BlockSpec((tb, dc), lambda i: (i, 0)),      # conditions tile
            const(w1.shape), const(b1.shape),
            const(w2.shape), const(b2.shape),
            const(w3.shape),
            pl.BlockSpec(memory_space=pltpu.SMEM),         # b3 scalar
        ],
        out_specs=pl.BlockSpec((tb, 1), lambda i: (i, 0)),
        compiler_params=pltpu.CompilerParams(
            dimension_semantics=("parallel",)),
        cost_estimate=pl.CostEstimate(
            flops=flops, transcendentals=0, bytes_accessed=bytes_accessed),
    )(x, conditions, w1, b1, w2, b2, w3, b3)

    return out


def init_params(key, input_dim, binary_dim):
    """f32 master params mimicking nn.Linear default init (U(+/- 1/sqrt(fan_in)))."""
    d0 = input_dim + binary_dim
    dims = [(d0, H1), (H1, H2), (H2, 1)]
    params = {}
    for i, (fan_in, fan_out) in enumerate(dims, start=1):
        key, kw, kb = jax.random.split(key, 3)
        bound = 1.0 / jnp.sqrt(jnp.float32(fan_in))
        params[f"w{i}"] = jax.random.uniform(
            kw, (fan_in, fan_out), jnp.float32, -bound, bound)
        params[f"b{i}"] = jax.random.uniform(
            kb, (1, fan_out), jnp.float32, -bound, bound)
    return params


def prepare_kernel_params(params):
    """Cast weights to bf16 for the MXU; keep biases in f32 (cast in-kernel)."""
    return {
        "w1": params["w1"].astype(jnp.bfloat16),   # (Dx+Dc, 256) fused layer-1 weight
        "b1": params["b1"],                        # (1, 256) f32
        "w2": params["w2"].astype(jnp.bfloat16),   # (256, 128)
        "b2": params["b2"],                        # (1, 128) f32
        "w3": params["w3"].astype(jnp.bfloat16),   # (128, 1) column for MXU final layer
        "b3": params["b3"].reshape(-1),            # (1,) f32 -> SMEM scalar
    }


def reference_forward(x, conditions, params):
    """Pure-JAX f32 reference for correctness checking."""
    inp = jnp.concatenate([x, conditions], axis=1)
    h1 = inp @ params["w1"] + params["b1"]
    h1 = jnp.where(h1 > 0, h1, NEG_SLOPE * h1)
    h2 = h1 @ params["w2"] + params["b2"]
    h2 = jnp.where(h2 > 0, h2, NEG_SLOPE * h2)
    return h2 @ params["w3"] + params["b3"]


if __name__ == "__main__":
    input_dim = 16
    binary_dim = 4
    batch = 8

    key = jax.random.PRNGKey(0)
    key, kx, kc = jax.random.split(key, 3)
    x = jax.random.normal(kx, (batch, input_dim), jnp.float32)
    conditions = (jax.random.uniform(kc, (batch, binary_dim)) > 0.5).astype(jnp.float32)

    params = init_params(key, input_dim, binary_dim)
    kparams = prepare_kernel_params(params)

    out = jax.block_until_ready(conditional_discriminator(x, conditions, kparams))
    ref = reference_forward(x, conditions, params)

    assert out.shape == (batch, 1), out.shape
    # bf16 MXU inputs / bf16 activations -> loosened tolerance vs. f32 reference.
    assert jnp.allclose(out, ref, atol=5e-2, rtol=5e-2), (out, ref)

    print("KERNEL_OK")
</pallas_src>

<mosaic_0001>
module attributes {stable_mosaic.version = 11 : i64} {
  func.func @_disc_kernel(%arg0: i32, %arg1: memref<8x16xf32, #tpu.memory_space<vmem>>, %arg2: memref<8x4xf32, #tpu.memory_space<vmem>>, %arg3: memref<20x256xbf16, #tpu.memory_space<vmem>>, %arg4: memref<1x256xf32, #tpu.memory_space<vmem>>, %arg5: memref<256x128xbf16, #tpu.memory_space<vmem>>, %arg6: memref<1x128xf32, #tpu.memory_space<vmem>>, %arg7: memref<128x1xbf16, #tpu.memory_space<vmem>>, %arg8: memref<1xf32, #tpu.memory_space<smem>>, %arg9: memref<8x1xf32, #tpu.memory_space<vmem>>) attributes {dimension_semantics = [#tpu.dimension_semantics<parallel>], iteration_bounds = array<i64: 1>, scalar_prefetch = 0 : i64, scratch_operands = 0 : i64, tpu.core_type = #tpu.core_type<tc>, window_params = [{transform_indices = @transform_0, window_bounds = array<i64: 8, 16>}, {transform_indices = @transform_1, window_bounds = array<i64: 8, 4>}, {pipeline_mode = #tpu.pipeline_mode<synchronous>, transform_indices = @transform_2, window_bounds = array<i64: 20, 256>}, {pipeline_mode = #tpu.pipeline_mode<synchronous>, transform_indices = @transform_3, window_bounds = array<i64: 1, 256>}, {pipeline_mode = #tpu.pipeline_mode<synchronous>, transform_indices = @transform_4, window_bounds = array<i64: 256, 128>}, {pipeline_mode = #tpu.pipeline_mode<synchronous>, transform_indices = @transform_5, window_bounds = array<i64: 1, 128>}, {pipeline_mode = #tpu.pipeline_mode<synchronous>, transform_indices = @transform_6, window_bounds = array<i64: 128, 1>}, {transform_indices = @transform_7, window_bounds = array<i64: 1>}, {transform_indices = @transform_8, window_bounds = array<i64: 8, 1>}]} {
    %c0 = arith.constant 0 : index
    %c0_0 = arith.constant 0 : index
    %0 = vector.load %arg1[%c0, %c0_0] : memref<8x16xf32, #tpu.memory_space<vmem>>, vector<8x16xf32>
    %c0_1 = arith.constant 0 : index
    %c0_2 = arith.constant 0 : index
    %1 = vector.load %arg2[%c0_1, %c0_2] : memref<8x4xf32, #tpu.memory_space<vmem>>, vector<8x4xf32>
    %2 = tpu.concatenate %0, %1 in 1 : vector<8x16xf32>, vector<8x4xf32> -> vector<8x20xf32>
    %3 = arith.truncf %2 : vector<8x20xf32> to vector<8x20xbf16>
    %c0_3 = arith.constant 0 : index
    %c0_4 = arith.constant 0 : index
    %4 = vector.load %arg3[%c0_3, %c0_4] : memref<20x256xbf16, #tpu.memory_space<vmem>>, vector<20x256xbf16>
    %cst = arith.constant dense<0.000000e+00> : vector<8x256xf32>
    %5 = tpu.matmul %3, %4, %cst {dimension_numbers = #tpu.dot_dimension_numbers<[1], [0], [0], [1], [0, 0, 1, 1], [], []>} : vector<8x20xbf16>, vector<20x256xbf16>, vector<8x256xf32> -> vector<8x256xf32>
    %6 = arith.truncf %5 : vector<8x256xf32> to vector<8x256xbf16>
    %c0_5 = arith.constant 0 : index
    %c0_6 = arith.constant 0 : index
    %7 = vector.load %arg4[%c0_5, %c0_6] : memref<1x256xf32, #tpu.memory_space<vmem>>, vector<1x256xf32>
    %8 = arith.truncf %7 : vector<1x256xf32> to vector<1x256xbf16>
    %9 = vector.broadcast %8 : vector<1x256xbf16> to vector<8x256xbf16>
    %10 = arith.addf %6, %9 : vector<8x256xbf16>
    %cst_7 = arith.constant 0.000000e+00 : bf16
    %11 = vector.broadcast %cst_7 : bf16 to vector<8x256xbf16>
    %12 = arith.cmpf ogt, %10, %11 : vector<8x256xbf16>
    %cst_8 = arith.constant 2.001950e-01 : bf16
    %13 = vector.broadcast %cst_8 : bf16 to vector<8x256xbf16>
    %14 = arith.mulf %13, %10 : vector<8x256xbf16>
    %15 = arith.select %12, %10, %14 : vector<8x256xi1>, vector<8x256xbf16>
    %c0_9 = arith.constant 0 : index
    %c0_10 = arith.constant 0 : index
    %16 = vector.load %arg5[%c0_9, %c0_10] : memref<256x128xbf16, #tpu.memory_space<vmem>>, vector<256x128xbf16>
    %cst_11 = arith.constant dense<0.000000e+00> : vector<8x128xf32>
    %17 = tpu.matmul %15, %16, %cst_11 {dimension_numbers = #tpu.dot_dimension_numbers<[1], [0], [0], [1], [0, 0, 1, 1], [], []>} : vector<8x256xbf16>, vector<256x128xbf16>, vector<8x128xf32> -> vector<8x128xf32>
    %18 = arith.truncf %17 : vector<8x128xf32> to vector<8x128xbf16>
    %c0_12 = arith.constant 0 : index
    %c0_13 = arith.constant 0 : index
    %19 = vector.load %arg6[%c0_12, %c0_13] : memref<1x128xf32, #tpu.memory_space<vmem>>, vector<1x128xf32>
    %20 = arith.truncf %19 : vector<1x128xf32> to vector<1x128xbf16>
    %21 = vector.broadcast %20 : vector<1x128xbf16> to vector<8x128xbf16>
    %22 = arith.addf %18, %21 : vector<8x128xbf16>
    %cst_14 = arith.constant 0.000000e+00 : bf16
    %23 = vector.broadcast %cst_14 : bf16 to vector<8x128xbf16>
    %24 = arith.cmpf ogt, %22, %23 : vector<8x128xbf16>
    %cst_15 = arith.constant 2.001950e-01 : bf16
    %25 = vector.broadcast %cst_15 : bf16 to vector<8x128xbf16>
    %26 = arith.mulf %25, %22 : vector<8x128xbf16>
    %27 = arith.select %24, %22, %26 : vector<8x128xi1>, vector<8x128xbf16>
    %c0_16 = arith.constant 0 : index
    %c0_17 = arith.constant 0 : index
    %28 = vector.load %arg7[%c0_16, %c0_17] : memref<128x1xbf16, #tpu.memory_space<vmem>>, vector<128x1xbf16>
    %cst_18 = arith.constant dense<0.000000e+00> : vector<8x1xf32>
    %29 = tpu.matmul %27, %28, %cst_18 {dimension_numbers = #tpu.dot_dimension_numbers<[1], [0], [0], [1], [0, 0, 1, 1], [], []>} : vector<8x128xbf16>, vector<128x1xbf16>, vector<8x1xf32> -> vector<8x1xf32>
    %c0_19 = arith.constant 0 : index
    %30 = memref.load %arg8[%c0_19] : memref<1xf32, #tpu.memory_space<smem>>
    %31 = vector.broadcast %30 : f32 to vector<8x1xf32>
    %32 = arith.addf %29, %31 : vector<8x1xf32>
    %c0_20 = arith.constant 0 : index
    %c0_21 = arith.constant 0 : index
    %33 = vector.load %arg9[%c0_20, %c0_21] : memref<8x1xf32, #tpu.memory_space<vmem>>, vector<8x1xf32>
    tpu.vector_store %arg9[%c0_20, %c0_21], %32 {strides = array<i32>} : memref<8x1xf32, #tpu.memory_space<vmem>>, vector<8x1xf32>,
    return
  }
  func.func @transform_0(%arg0: i32) -> (i32, i32) {
    %c0_i32 = arith.constant 0 : i32
    %c0_i32_0 = arith.constant 0 : i32
    return %arg0, %c0_i32 : i32, i32
  }
  func.func @transform_1(%arg0: i32) -> (i32, i32) {
    %c0_i32 = arith.constant 0 : i32
    %c0_i32_0 = arith.constant 0 : i32
    return %arg0, %c0_i32 : i32, i32
  }
  func.func @transform_2(%arg0: i32) -> (i32, i32) {
    %c0_i32 = arith.constant 0 : i32
    %c0_i32_0 = arith.constant 0 : i32
    %c0_i32_1 = arith.constant 0 : i32
    return %c0_i32, %c0_i32_0 : i32, i32
  }
  func.func @transform_3(%arg0: i32) -> (i32, i32) {
    %c0_i32 = arith.constant 0 : i32
    %c0_i32_0 = arith.constant 0 : i32
    %c0_i32_1 = arith.constant 0 : i32
    return %c0_i32, %c0_i32_0 : i32, i32
  }
  func.func @transform_4(%arg0: i32) -> (i32, i32) {
    %c0_i32 = arith.constant 0 : i32
    %c0_i32_0 = arith.constant 0 : i32
    %c0_i32_1 = arith.constant 0 : i32
    return %c0_i32, %c0_i32_0 : i32, i32
  }
  func.func @transform_5(%arg0: i32) -> (i32, i32) {
    %c0_i32 = arith.constant 0 : i32
    %c0_i32_0 = arith.constant 0 : i32
    %c0_i32_1 = arith.constant 0 : i32
    return %c0_i32, %c0_i32_0 : i32, i32
  }
  func.func @transform_6(%arg0: i32) -> (i32, i32) {
    %c0_i32 = arith.constant 0 : i32
    %c0_i32_0 = arith.constant 0 : i32
    %c0_i32_1 = arith.constant 0 : i32
    return %c0_i32, %c0_i32_0 : i32, i32
  }
  func.func @transform_7(%arg0: i32) -> i32 {
    %c0_i32 = arith.constant 0 : i32
    %c0_i32_0 = arith.constant 0 : i32
    return %c0_i32 : i32
  }
  func.func @transform_8(%arg0: i32) -> (i32, i32) {
    %c0_i32 = arith.constant 0 : i32
    %c0_i32_0 = arith.constant 0 : i32
    return %arg0, %c0_i32 : i32, i32
  }
}

</mosaic_0001>

<bundles_post_ra>
// kernel: tpu_custom_call.1
= control target key start
LH: loop header
LB: loop body
LE: loop exit
PB: predicated region body
PF: predicated region fallthrough
CT: control target
= control target key end

     0   :  { %14 = vsyncpa [#allocation4], 0  ;;  %s599_s27 = smov [#allocation3]   ;;  %s714_s0 = inlined_call_operand.vmem [shape: f32[8,16], index: 0, kind: input, shape index: {}]   ;;  %s715_s1 = inlined_call_operand.vmem [shape: f32[8,4], index: 1, kind: input, shape index: {}]   ;;  %s716_s2 = inlined_call_operand.vmem [shape: bf16[20,256], index: 2, kind: input, shape index: {}]   ;;  %s717_s3 = inlined_call_operand.vmem [shape: f32[1,256], index: 3, kind: input, shape index: {}]   ;;  %s718_s4 = inlined_call_operand.hbm [shape: bf16[256,128], index: 4, kind: input, shape index: {}]   ;;  %s719_s5 = inlined_call_operand.vmem [shape: f32[1,128], index: 5, kind: input, shape index: {}]   ;;  %s720_s6 = inlined_call_operand.vmem [shape: bf16[128,1], index: 6, kind: input, shape index: {}]   ;;  %s721_s7 = inlined_call_operand.<no memory space> [shape: f32[1], index: 7, kind: input, shape index: {}]   ;;  %s722_s8 = inlined_call_operand.vmem [shape: f32[8,1], index: 8, kind: output, shape index: {}]  }
   0x1   :  { %s28_s28 = sshll.u32 %s599_s27, 4  ;;  %s575_s9 = scalar_lea.hbm %s718_s4, 2048  ;;  %s29_s28 = int_to_ptr.vmem [resolvable:$true] %s28_s28 }
   0x2   :  { %p576_p0 = scmp.ne.s32.totalorder %s718_s4, %s575_s9  ;;  %p579_p1 = scmp.lt.u32.totalorder %s575_s9, %s718_s4 }
   0x4   :  { %p581_p2 = pnand %p579_p1, %p576_p0 }
   0x6   :  { %584 = shalt.err (!%p581_p2)
}
   0x7   :  { %s585_s14 = scalar_lea.vmem %s29_s28, 2048  ;;  %p590_p4 = scmp.lt.s32.totalorder %s29_s28, %s29_s28 }
   0x8   :  { %p586_p3 = scmp.ne.s32.totalorder %s29_s28, %s585_s14  ;;  %p591_p5 = scmp.lt.s32.totalorder %s585_s14, %s585_s14 }
   0xa   :  { %p592_p6 = por %p591_p5, %p590_p4 }
   0xc   :  { %p593_p7 = pnand %p592_p6, %p586_p3 }
   0xe   :  { %596 = shalt.err (!%p593_p7)
}
   0xf   :  { %s600_s15 = smov 64   ;;  %s601_s16 = smov 4  }
  0x10   :  { %34 = dma.hbm_to_vmem [thread:$0]  %s718_s4, 2048, %s29_s28, [#allocation4], %s600_s15, %s600_s15, %s601_s16  }
  0x11   :  { %597 = dma.done.wait [#allocation4], 2048  }
  0x12   :  { %598 = vsyncadd [#allocation4], 4294965248  ;;  %v602_v0 = vmov 0   ;;  %v47_v1 = vld [vmem:[%s715_s1] sm:$0xff]  ;;  %s603_s21 = smov 16   ;;  %vm77_vm0 = vcmask 1041408   ;;  %v129_v34 = vlaneseq }
  0x13   :  { %116 = vmatprep.mubr.bf16.mxu0 %v602_v0  ;;  %49 = vrot.lane.b32.xlu0 %v47_v1, %s603_s21  ;;  %v546_v2 = vld [vmem:[%s716_s2 + $0x4] ss:$8 sps:$4 sm:$0xff]   ;;  %v548_v3 = vld [vmem:[%s716_s2] ss:$8 sps:$4 sm:$0xff]   ;;  %v57_v4 = vld [vmem:[%s716_s2 + $0x10] sm:$0x33] }
  0x14   :  { %84 = vmatprep.subr.bf16.mxu0 %v546_v2  ;;  %v461_v5 = vcombine.high %v57_v4, %v57_v4  ;;  %v460_v6 = vcombine.low %v57_v4, %v57_v4  ;;  %v551_v7 = vld [vmem:[#allocation3 + $0x40] sm:$0xff]   ;;  %v553_v10 = vld [vmem:[#allocation3 + $0x48] sm:$0xff]   ;;  %v555_v12 = vld [vmem:[#allocation3 + $0x50] sm:$0xff]   ;;  %vm52_vm1 = vcmask 130048   ;;  %vm73_vm2 = vcmask 162816  }
  0x15   :  { %85 = vmatpush1.bf16.msra.mxu0 %v548_v3  ;;  %v552_v8 = vld [vmem:[#allocation3] sm:$0xff]   ;;  %488 = vmatprep.subr.bf16.mxu1 %v551_v7  ;;  %v554_v11 = vld [vmem:[#allocation3 + $0x8] sm:$0xff]   ;;  %v556_v13 = vld [vmem:[#allocation3 + $0x10] sm:$0xff]   ;;  %v604_v29 = vmov 0.0   ;;  %v130_v35 = vshrl.u32 %v129_v34, 7  ;;  %vm605_vm5 = vmmov 0  }
  0x16   :  { %462 = vmatprep.subr.msk.bf16.mxu0 %vm77_vm0, %v461_v5  ;;  %v79_v9 = vsel %vm77_vm0, %v460_v6, 0  ;;  %489 = vmatpush3.bf16.msra.mxu1 %v552_v8  ;;  %v557_v14 = vld [vmem:[#allocation3 + $0x58] sm:$0xff]   ;;  %v559_v16 = vld [vmem:[#allocation3 + $0x60] sm:$0xff]   ;;  %v561_v18 = vld [vmem:[#allocation3 + $0x68] sm:$0xff]   ;;  %vm451_vm7 = vcmask 7168  }
  0x17   :  { %490 = vmatprep.subr.bf16.mxu1 %v553_v10  ;;  %v558_v15 = vld [vmem:[#allocation3 + $0x18] sm:$0xff]   ;;  %v560_v17 = vld [vmem:[#allocation3 + $0x20] sm:$0xff]   ;;  %v562_v19 = vld [vmem:[#allocation3 + $0x28] sm:$0xff]   ;;  %v131_v36 = vsub.s32 0, %v130_v35  ;;  %v135_v38 = vsub.s32 1, %v130_v35 }
  0x18   :  { %v46_v20 = vld [vmem:[%s714_s0] sm:$0xff]  ;;  %v563_v24 = vld [vmem:[#allocation3 + $0x70] sm:$0xff]   ;;  %v565_v26 = vld [vmem:[#allocation3 + $0x78] sm:$0xff]  }
  0x19   :  { %87 = vmatpush1.bf16.msra.mxu0 %v79_v9  ;;  %v564_v25 = vld [vmem:[#allocation3 + $0x30] sm:$0xff]   ;;  %v566_v27 = vld [vmem:[#allocation3 + $0x38] sm:$0xff]   ;;  %v567_v28 = vld [vmem:[%s720_s6] sm:$0xff]  }
  0x1a   :  { %491 = vmatpush3.bf16.msra.mxu1 %v554_v11  ;;  %519 = vmatprep.subr.bf16.mxu0 %v604_v29  ;;  %v568_v30 = vld [vmem:[%s720_s6 + $0x8] sm:$0xff]   ;;  %v569_v31 = vld [vmem:[%s720_s6 + $0x10] sm:$0xff]   ;;  %v570_v32 = vld [vmem:[%s720_s6 + $0x18] sm:$0xff]   ;;  %v362_v11 = vstv %s721_s7 }
  0x1b   :  { %492 = vmatprep.subr.bf16.mxu1 %v555_v12  ;;  %v571_v33 = vld [vmem:[%s720_s6 + $0x20] sm:$0xff]   ;;  %v572_v59 = vld [vmem:[%s720_s6 + $0x28] sm:$0xff]   ;;  %v573_v60 = vld [vmem:[%s720_s6 + $0x30] sm:$0xff]  }
  0x1c   :  { %v127_v37 = vld [vmem:[%s717_s3] sm:$0x3]  ;;  %v574_v61 = vld [vmem:[%s720_s6 + $0x38] sm:$0xff]  }
  0x1d   :  { %v132_v39 = vrot.slane %v127_v37, %v131_v36  ;;  %v136_v40 = vrot.slane %v127_v37, %v135_v38  ;;  %v332_v62 = vld [vmem:[%s719_s5] sm:$0x1] }
  0x1e   :  { %493 = vmatpush3.bf16.msra.mxu1 %v556_v13  ;;  %v333_v63 = vpack.c.bf16 %v332_v62, %v332_v62 }
  0x1f   :  { %494 = vmatprep.subr.bf16.mxu1 %v557_v14  ;;  %v139_v41 = vpack.c.bf16 %v132_v39, %v132_v39  ;;  %v140_v42 = vpack.c.bf16 %v136_v40, %v136_v40 }
  0x20   :  { %v335_v0 = vpack.i.b16 %v333_v63, %v333_v63 }
  0x21   :  { %v142_v43 = vpack.i.b16 %v139_v41, %v139_v41  ;;  %v149_v44 = vpack.i.b16 %v140_v42, %v140_v42 }
  0x22   :  { %495 = vmatpush3.bf16.msra.mxu1 %v558_v15  ;;  %v340_v4 = vrot.slane %v335_v0, %v131_v36 }
  0x23   :  { %496 = vmatprep.subr.bf16.mxu1 %v559_v16  ;;  %v147_v45 = vrot.slane %v142_v43, %v131_v36  ;;  %v154_v47 = vrot.slane %v149_v44, %v131_v36 }
  0x26   :  { %497 = vmatpush3.bf16.msra.mxu1 %v560_v17 }
  0x27   :  { %498 = vmatprep.subr.bf16.mxu1 %v561_v18 }
  0x2a   :  { %499 = vmatpush3.bf16.msra.mxu1 %v562_v19 }
  0x2b   :  { %500 = vmatprep.subr.bf16.mxu1 %v563_v24 }
  0x2e   :  { %501 = vmatpush3.bf16.msra.mxu1 %v564_v25 }
  0x2f   :  { %502 = vmatprep.subr.bf16.mxu1 %v565_v26 }
  0x32   :  { %503 = vmatpush3.bf16.msra.mxu1 %v566_v27 }
  0x85   :  { %v50_v21 = vpop.permute.xlu0 %49 }
  0x86   :  { %v53_v22 = vsel %vm52_vm1, %v46_v20, %v50_v21 }
  0x87   :  { %v54_v23 = vpack.c.bf16 %v53_v22, %v53_v22 }
  0x89   :  { %463 = vmatmul.mubr.msk.bf16.vlgmr.msra.gmra.mrb[0].mxu0 %vm73_vm2, %v54_v23 }
  0x8a   :  { %520 = vmatpush3.bf16.msra.mxu0 %v567_v28  ;;  %535 = vmatprep.mubr.msk.bf16.mxu0 %vm605_vm5, %v604_v29 }
  0x8b   :  { %521 = vmatprep.subr.bf16.mxu0 %v604_v29 }
  0x8e   :  { %522 = vmatpush3.bf16.msra.mxu0 %v568_v30 }
  0x8f   :  { %523 = vmatprep.subr.bf16.mxu0 %v604_v29 }
  0x92   :  { %524 = vmatpush3.bf16.msra.mxu0 %v569_v31 }
  0x93   :  { %525 = vmatprep.subr.bf16.mxu0 %v604_v29 }
  0x96   :  { %526 = vmatpush3.bf16.msra.mxu0 %v570_v32 }
  0x97   :  { %527 = vmatprep.subr.bf16.mxu0 %v604_v29 }
  0x9a   :  { %528 = vmatpush3.bf16.msra.mxu0 %v571_v33 }
  0x9b   :  { %529 = vmatprep.subr.bf16.mxu0 %v604_v29 }
  0x9e   :  { %530 = vmatpush3.bf16.msra.mxu0 %v572_v59 }
  0x9f   :  { %531 = vmatprep.subr.bf16.mxu0 %v604_v29 }
  0xa2   :  { %532 = vmatpush3.bf16.msra.mxu0 %v573_v60 }
  0xa3   :  { %533 = vmatprep.subr.bf16.mxu0 %v604_v29 }
  0xa6   :  { %534 = vmatpush3.bf16.msra.mxu0 %v574_v61 }
 0x15c   :  { %v118_v46 = vpop.f32.mrb[0].mxu0 }
 0x15d   :  { %v125_v48 = vpack.c.bf16 %v118_v46, %v118_v46  ;;  %v120_v49 = vpop.f32.mrb[1].mxu0 }
 0x15e   :  { %v126_v50 = vpack.c.bf16 %v120_v49, %v120_v49  ;;  %v122_v51 = vpop.f32.mrb[2].mxu0 }
 0x15f   :  { %v155_v52 = vadd.bf16 %v147_v45, %v125_v48  ;;  %v123_v53 = vpop.f32.mrb[3].mxu0 }
 0x160   :  { %v156_v54 = vadd.bf16 %v154_v47, %v126_v50 }
 0x161   :  { %v159_v55 = vmul.bf16 1045249613, %v155_v52  ;;  %vm157_vm4 = vcmp.gt.bf16.partialorder %v155_v52, 0 }
 0x162   :  { %vm158_vm3 = vcmp.gt.bf16.partialorder %v156_v54, 0  ;;  %v160_v56 = vmul.bf16 1045249613, %v156_v54 }
 0x163   :  { %v161_v58 = vsel %vm157_vm4, %v155_v52, %v159_v55 }
 0x164   :  { %v162_v57 = vsel %vm158_vm3, %v156_v54, %v160_v56 }
 0x165   :  { %323 = vmatprep.mubr.bf16.mxu1 %v162_v57 }
 0x166   :  { %324 = vmatmul.mubr.bf16.vlgmr.msra.gmra.mrb[0].mxu1 %v161_v58 }
 0x239   :  { %v504_v1 = vpop.f32.mrb[0].mxu1 }
 0x23a   :  { %v505_v2 = vpop.f32.mrb[1].mxu1 }
 0x23b   :  { %v506_v3 = vadd.f32 %v505_v2, %v504_v1  ;;  %v507_v5 = vpop.f32.mrb[2].mxu1 }
 0x23c   :  { %v508_v6 = vpop.f32.mrb[3].mxu1 }
 0x23d   :  { %v331_v7 = vpack.c.bf16 %v506_v3, %v506_v3 }
 0x23f   :  { %v341_v8 = vadd.bf16 %v340_v4, %v331_v7 }
 0x241   :  { %v343_v9 = vmul.bf16 1045249613, %v341_v8  ;;  %vm342_vm6 = vcmp.gt.bf16.partialorder %v341_v8, 0 }
 0x243   :  { %v344_v10 = vsel %vm342_vm6, %v341_v8, %v343_v9 }
 0x244   :  { %536 = vmatmul.mubr.bf16.vlgmr.msra.gmra.mrb[4].mxu0 %v344_v10 }
 0x317   :  { %v445_v12 = vpop.f32.mrb[4].mxu0 }
 0x318   :  { %v446_v13 = vadd.f32 %v445_v12, %v362_v11  ;;  %v537_v14 = vpop.f32.mrb[5].mxu0 }
 0x319   :  { %v448_v15 = vpop.f32.mrb[6].mxu0 }
 0x31a   :  { %452 = vst.msk [vmem:[%s722_s8] sm:$0xff] %vm451_vm7, %v446_v13  ;;  %v538_v16 = vpop.f32.mrb[7].mxu0 }
 0x31b   :  { %457 = vsyncpa [#allocation4], 1 }

</bundles_post_ra>
